<compile_context>
chip_gen: v7x
topology: tpu7x:2x2x1
jax: 0.10.0
libtpu: 0.0.40
codegen_flags: <defaults>
</compile_context>

<pallas_src>
import jax
import jax.numpy as jnp
from jax.experimental import pallas as pl
from jax.experimental.pallas import tpu as pltpu


def _lse_kernel(coords_ref, nbr_ref, dist_ref, feat_ref,
                w_nb_ref, w_ce_ref, w_d_ref, b_ref, o_ref):
    c_cl = coords_ref[0]                     # (tn, 3)      channels-last center coords
    nb_cf = nbr_ref[0]                       # (3, tn*K)    channels-first neighbor coords
    dd = dist_ref[0]                         # (1, tn*K)    distances
    f_cl = feat_ref[0]                       # (tn, d)      channels-last features
    tn = c_cl.shape[0]
    d = f_cl.shape[-1]
    tnk = nb_cf.shape[-1]
    K = tnk // tn

    # neighbor + dist + bias terms, computed channels-first on the big lane-dense slab
    yn = jax.lax.dot_general(w_nb_ref[...], nb_cf, (((1,), (0,)), ((), ())),
                             preferred_element_type=jnp.float32)        # (d, tn*K)
    yn = yn + w_d_ref[...] * dd + b_ref[...]                            # (d,1)x(1,tnk) bcasts

    # center term: one small GEMM per point (channels-last), then replicate over the
    # K neighbors via sublane broadcast + (free, K%8==0) reshape; features likewise.
    yc_cl = jnp.dot(c_cl, w_ce_ref[...], preferred_element_type=jnp.float32)  # (tn, d)
    yc_rep = jnp.broadcast_to(yc_cl[:, None, :], (tn, K, d)).reshape(tnk, d)
    f_rep = jnp.broadcast_to(f_cl[:, None, :], (tn, K, d)).reshape(tnk, d)

    # move replicated blocks to channels-first with XLU transposes (XLU idle here),
    # finish with ReLU, and write the two channel halves of the lane-dense output.
    y = jnp.maximum(yn + jnp.transpose(yc_rep), 0.0)                    # (d, tn*K)
    o_ref[0, 0:d, :] = y.astype(o_ref.dtype)
    o_ref[0, d:, :] = jnp.transpose(f_rep).astype(o_ref.dtype)


def local_spatial_encoding(coords, features, dist, idx, w_eff, b_eff, *, tile_n=None):
    """coords (B,N,3) f32, features (B,d,N,1) f32, dist (B,N,K) f32, idx (B,N,K) i32.
    Returns (B, 2*d, N, K) f32, matching the PyTorch module output layout."""
    B, N, _ = coords.shape
    K = idx.shape[-1]
    d = features.shape[1]

    # --- glue (all cheap relative to the output tensor) ---
    coords_t = jnp.transpose(coords, (0, 2, 1))                       # (B, 3, N)   tiny
    idx_flat = idx.reshape(B, N * K).astype(jnp.int32)
    nbrs_cf = jax.vmap(lambda ct, i: ct[:, i])(coords_t, idx_flat)    # (B, 3, N*K) gather
    dist_r = dist.reshape(B, 1, N * K)                                # free reshape
    feat_cl = jnp.transpose(features[:, :, :, 0], (0, 2, 1))          # (B, N, d)   tiny

    # fold the encoding algebra into the (BN-folded) conv weights
    wc, wn, wdf, wd = w_eff[0:3], w_eff[3:6], w_eff[6:9], w_eff[9:10]  # rows of (10, d)
    w_ce = wc + wdf                                                    # (3, d) center GEMM
    w_nb = jnp.transpose(wn - wdf)                                     # (d, 3) neighbor GEMM
    w_d_col = jnp.transpose(wd)                                        # (d, 1)
    b_col = jnp.transpose(b_eff)                                       # (d, 1)

    if tile_n is None:
        tile_n = N if N <= 512 else 512
    assert N % tile_n == 0, "N must be divisible by tile_n"  # TODO(synk): pad ragged N
    assert (tile_n * K) % 128 == 0 or tile_n == N, "tile_n*K should be a multiple of 128"

    grid = (B, N // tile_n)
    tnk = tile_n * K
    out = pl.pallas_call(
        _lse_kernel,
        out_shape=jax.ShapeDtypeStruct((B, 2 * d, N * K), jnp.float32),
        grid_spec=pltpu.PrefetchScalarGridSpec(
            num_scalar_prefetch=0,
            grid=grid,
            in_specs=[
                pl.BlockSpec((1, tile_n, 3), lambda b, i: (b, i, 0)),   # coords (B,N,3)
                pl.BlockSpec((1, 3, tnk), lambda b, i: (b, 0, i)),      # nbrs   (B,3,N*K)
                pl.BlockSpec((1, 1, tnk), lambda b, i: (b, 0, i)),      # dist   (B,1,N*K)
                pl.BlockSpec((1, tile_n, d), lambda b, i: (b, i, 0)),   # feats  (B,N,d)
                pl.BlockSpec((d, 3), lambda b, i: (0, 0)),              # w_nb
                pl.BlockSpec((3, d), lambda b, i: (0, 0)),              # w_ce
                pl.BlockSpec((d, 1), lambda b, i: (0, 0)),              # w_d
                pl.BlockSpec((d, 1), lambda b, i: (0, 0)),              # bias
            ],
            out_specs=pl.BlockSpec((1, 2 * d, tnk), lambda b, i: (b, 0, i)),
        ),
        compiler_params=pltpu.CompilerParams(
            dimension_semantics=("parallel", "parallel"),
            vmem_limit_bytes=64 * 1024 * 1024),
    )(coords, nbrs_cf, dist_r, feat_cl, w_nb, w_ce, w_d_col, b_col)

    # free minor-dim reshape back to the PyTorch NCHW convention
    return out.reshape(B, 2 * d, N, K)


def init_params(d, key):
    """Deterministic synthetic init for SharedMLP(10, d, bn=True, ReLU)."""
    k1, k2 = jax.random.split(key)
    w_conv = jax.random.normal(k1, (d, 10), jnp.float32) * 0.1   # Conv2d(10, d, 1) weight
    b_conv = jax.random.normal(k2, (d,), jnp.float32) * 0.1      # Conv2d bias
    gamma = jnp.ones((d,), jnp.float32)                          # BN defaults
    beta = jnp.zeros((d,), jnp.float32)
    running_mean = jnp.zeros((d,), jnp.float32)
    running_var = jnp.ones((d,), jnp.float32)
    eps = 1e-6                                                   # module uses eps=1e-06
    scale = gamma / jnp.sqrt(running_var + eps)
    w_eff = (w_conv * scale[:, None]).T                          # (10, d)
    b_eff = ((b_conv - running_mean) * scale + beta)[None, :]    # (1, d)
    return w_eff, b_eff


if __name__ == "__main__":
    key = jax.random.PRNGKey(0)
    B, N, K, d = 2, 16, 8, 8
    kc, kf, kd, ki, kp = jax.random.split(key, 5)
    coords = jax.random.normal(kc, (B, N, 3), jnp.float32)         # (B, N, 3)
    features = jax.random.normal(kf, (B, d, N, 1), jnp.float32)    # (B, d, N, 1)
    dist = jax.random.uniform(kd, (B, N, K), jnp.float32)          # (B, N, K)
    idx = jax.random.randint(ki, (B, N, K), 0, N, jnp.int32)       # (B, N, K)
    w_eff, b_eff = init_params(d, kp)

    out = local_spatial_encoding(coords, features, dist, idx, w_eff, b_eff)
    out = jax.block_until_ready(out)
    assert out.shape == (B, 2 * d, N, K), out.shape

    # pure-JAX reference (same folded params) for a correctness sanity check
    nbrs = jax.vmap(lambda c, i: c[i])(coords, idx)                        # (B,N,K,3)
    ce = jnp.broadcast_to(coords[:, :, None, :], (B, N, K, 3))
    x10 = jnp.concatenate([ce, nbrs, ce - nbrs, dist[..., None]], axis=-1)
    mlp = jnp.maximum(jnp.einsum('bnkc,cd->bnkd', x10, w_eff) + b_eff[0], 0.0)
    feat = jnp.broadcast_to(
        jnp.transpose(features[..., 0], (0, 2, 1))[:, :, None, :], (B, N, K, d))
    ref = jnp.transpose(jnp.concatenate([mlp, feat], axis=-1), (0, 3, 1, 2))
    assert jnp.allclose(out, ref, atol=1e-5, rtol=1e-5), "mismatch vs JAX reference"

    print("KERNEL_OK")
</pallas_src>

<mosaic_0001>
module attributes {stable_mosaic.version = 11 : i64} {
  func.func @_lse_kernel(%arg0: i32, %arg1: i32, %arg2: memref<1x16x3xf32, #tpu.memory_space<vmem>>, %arg3: memref<1x3x128xf32, #tpu.memory_space<vmem>>, %arg4: memref<1x1x128xf32, #tpu.memory_space<vmem>>, %arg5: memref<1x16x8xf32, #tpu.memory_space<vmem>>, %arg6: memref<8x3xf32, #tpu.memory_space<vmem>>, %arg7: memref<3x8xf32, #tpu.memory_space<vmem>>, %arg8: memref<8x1xf32, #tpu.memory_space<vmem>>, %arg9: memref<8x1xf32, #tpu.memory_space<vmem>>, %arg10: memref<1x16x128xf32, #tpu.memory_space<vmem>>) attributes {dimension_semantics = [#tpu.dimension_semantics<parallel>, #tpu.dimension_semantics<parallel>], iteration_bounds = array<i64: 2, 1>, scalar_prefetch = 0 : i64, scratch_operands = 0 : i64, tpu.core_type = #tpu.core_type<tc>, window_params = [{transform_indices = @transform_0, window_bounds = array<i64: 1, 16, 3>}, {transform_indices = @transform_1, window_bounds = array<i64: 1, 3, 128>}, {transform_indices = @transform_2, window_bounds = array<i64: 1, 1, 128>}, {transform_indices = @transform_3, window_bounds = array<i64: 1, 16, 8>}, {pipeline_mode = #tpu.pipeline_mode<synchronous>, transform_indices = @transform_4, window_bounds = array<i64: 8, 3>}, {pipeline_mode = #tpu.pipeline_mode<synchronous>, transform_indices = @transform_5, window_bounds = array<i64: 3, 8>}, {pipeline_mode = #tpu.pipeline_mode<synchronous>, transform_indices = @transform_6, window_bounds = array<i64: 8, 1>}, {pipeline_mode = #tpu.pipeline_mode<synchronous>, transform_indices = @transform_7, window_bounds = array<i64: 8, 1>}, {transform_indices = @transform_8, window_bounds = array<i64: 1, 16, 128>}]} {
    %c0 = arith.constant 0 : index
    %c0_0 = arith.constant 0 : index
    %c0_1 = arith.constant 0 : index
    %0 = vector.load %arg2[%c0, %c0_0, %c0_1] : memref<1x16x3xf32, #tpu.memory_space<vmem>>, vector<1x16x3xf32>
    %1 = vector.shape_cast %0 : vector<1x16x3xf32> to vector<16x3xf32>
    %c0_2 = arith.constant 0 : index
    %c0_3 = arith.constant 0 : index
    %c0_4 = arith.constant 0 : index
    %2 = vector.load %arg3[%c0_2, %c0_3, %c0_4] : memref<1x3x128xf32, #tpu.memory_space<vmem>>, vector<1x3x128xf32>
    %3 = vector.shape_cast %2 : vector<1x3x128xf32> to vector<3x128xf32>
    %c0_5 = arith.constant 0 : index
    %c0_6 = arith.constant 0 : index
    %c0_7 = arith.constant 0 : index
    %4 = vector.load %arg4[%c0_5, %c0_6, %c0_7] : memref<1x1x128xf32, #tpu.memory_space<vmem>>, vector<1x1x128xf32>
    %5 = vector.shape_cast %4 : vector<1x1x128xf32> to vector<1x128xf32>
    %c0_8 = arith.constant 0 : index
    %c0_9 = arith.constant 0 : index
    %c0_10 = arith.constant 0 : index
    %6 = vector.load %arg5[%c0_8, %c0_9, %c0_10] : memref<1x16x8xf32, #tpu.memory_space<vmem>>, vector<1x16x8xf32>
    %7 = vector.shape_cast %6 : vector<1x16x8xf32> to vector<16x8xf32>
    %c0_11 = arith.constant 0 : index
    %c0_12 = arith.constant 0 : index
    %8 = vector.load %arg6[%c0_11, %c0_12] : memref<8x3xf32, #tpu.memory_space<vmem>>, vector<8x3xf32>
    %cst = arith.constant dense<0.000000e+00> : vector<8x128xf32>
    %9 = tpu.matmul %8, %3, %cst {dimension_numbers = #tpu.dot_dimension_numbers<[1], [0], [0], [1], [0, 0, 1, 1], [], []>} : vector<8x3xf32>, vector<3x128xf32>, vector<8x128xf32> -> vector<8x128xf32>
    %c0_13 = arith.constant 0 : index
    %c0_14 = arith.constant 0 : index
    %10 = vector.load %arg8[%c0_13, %c0_14] : memref<8x1xf32, #tpu.memory_space<vmem>>, vector<8x1xf32>
    %11 = vector.broadcast %10 : vector<8x1xf32> to vector<8x128xf32>
    %12 = vector.broadcast %5 : vector<1x128xf32> to vector<8x128xf32>
    %13 = arith.mulf %11, %12 : vector<8x128xf32>
    %14 = arith.addf %9, %13 : vector<8x128xf32>
    %c0_15 = arith.constant 0 : index
    %c0_16 = arith.constant 0 : index
    %15 = vector.load %arg9[%c0_15, %c0_16] : memref<8x1xf32, #tpu.memory_space<vmem>>, vector<8x1xf32>
    %16 = vector.broadcast %15 : vector<8x1xf32> to vector<8x128xf32>
    %17 = arith.addf %14, %16 : vector<8x128xf32>
    %c0_17 = arith.constant 0 : index
    %c0_18 = arith.constant 0 : index
    %18 = vector.load %arg7[%c0_17, %c0_18] : memref<3x8xf32, #tpu.memory_space<vmem>>, vector<3x8xf32>
    %cst_19 = arith.constant dense<0.000000e+00> : vector<16x8xf32>
    %19 = tpu.matmul %1, %18, %cst_19 {dimension_numbers = #tpu.dot_dimension_numbers<[1], [0], [0], [1], [0, 0, 1, 1], [], []>} : vector<16x3xf32>, vector<3x8xf32>, vector<16x8xf32> -> vector<16x8xf32>
    %20 = vector.shape_cast %19 : vector<16x8xf32> to vector<16x1x8xf32>
    %21 = vector.shape_cast %20 : vector<16x1x8xf32> to vector<16x1x8xf32>
    %22 = vector.broadcast %21 : vector<16x1x8xf32> to vector<16x8x8xf32>
    %23 = vector.shape_cast %22 : vector<16x8x8xf32> to vector<128x8xf32>
    %24 = vector.shape_cast %7 : vector<16x8xf32> to vector<16x1x8xf32>
    %25 = vector.shape_cast %24 : vector<16x1x8xf32> to vector<16x1x8xf32>
    %26 = vector.broadcast %25 : vector<16x1x8xf32> to vector<16x8x8xf32>
    %27 = vector.shape_cast %26 : vector<16x8x8xf32> to vector<128x8xf32>
    %28 = tpu.transpose %23, [1, 0] : vector<128x8xf32> -> vector<8x128xf32>
    %29 = arith.addf %17, %28 : vector<8x128xf32>
    %cst_20 = arith.constant 0.000000e+00 : f32
    %30 = vector.broadcast %cst_20 : f32 to vector<8x128xf32>
    %31 = arith.maximumf %29, %30 : vector<8x128xf32>
    %c0_21 = arith.constant 0 : index
    %c0_22 = arith.constant 0 : index
    %c0_23 = arith.constant 0 : index
    %32 = vector.load %arg10[%c0_21, %c0_22, %c0_23] : memref<1x16x128xf32, #tpu.memory_space<vmem>>, vector<1x8x128xf32>
    %33 = vector.shape_cast %32 : vector<1x8x128xf32> to vector<8x128xf32>
    %34 = vector.shape_cast %31 : vector<8x128xf32> to vector<1x8x128xf32>
    tpu.vector_store %arg10[%c0_21, %c0_22, %c0_23], %34 {strides = array<i32>} : memref<1x16x128xf32, #tpu.memory_space<vmem>>, vector<1x8x128xf32>,
    %35 = tpu.transpose %27, [1, 0] : vector<128x8xf32> -> vector<8x128xf32>
    %c0_24 = arith.constant 0 : index
    %c8 = arith.constant 8 : index
    %c0_25 = arith.constant 0 : index
    %36 = vector.load %arg10[%c0_24, %c8, %c0_25] : memref<1x16x128xf32, #tpu.memory_space<vmem>>, vector<1x8x128xf32>
    %37 = vector.shape_cast %36 : vector<1x8x128xf32> to vector<8x128xf32>
    %38 = vector.shape_cast %35 : vector<8x128xf32> to vector<1x8x128xf32>
    tpu.vector_store %arg10[%c0_24, %c8, %c0_25], %38 {strides = array<i32>} : memref<1x16x128xf32, #tpu.memory_space<vmem>>, vector<1x8x128xf32>,
    return
  }
  func.func @transform_0(%arg0: i32, %arg1: i32) -> (i32, i32, i32) {
    %c0_i32 = arith.constant 0 : i32
    %c0_i32_0 = arith.constant 0 : i32
    return %arg0, %arg1, %c0_i32 : i32, i32, i32
  }
  func.func @transform_1(%arg0: i32, %arg1: i32) -> (i32, i32, i32) {
    %c0_i32 = arith.constant 0 : i32
    %c0_i32_0 = arith.constant 0 : i32
    return %arg0, %c0_i32, %arg1 : i32, i32, i32
  }
  func.func @transform_2(%arg0: i32, %arg1: i32) -> (i32, i32, i32) {
    %c0_i32 = arith.constant 0 : i32
    %c0_i32_0 = arith.constant 0 : i32
    return %arg0, %c0_i32, %arg1 : i32, i32, i32
  }
  func.func @transform_3(%arg0: i32, %arg1: i32) -> (i32, i32, i32) {
    %c0_i32 = arith.constant 0 : i32
    %c0_i32_0 = arith.constant 0 : i32
    return %arg0, %arg1, %c0_i32 : i32, i32, i32
  }
  func.func @transform_4(%arg0: i32, %arg1: i32) -> (i32, i32) {
    %c0_i32 = arith.constant 0 : i32
    %c0_i32_0 = arith.constant 0 : i32
    %c0_i32_1 = arith.constant 0 : i32
    return %c0_i32, %c0_i32_0 : i32, i32
  }
  func.func @transform_5(%arg0: i32, %arg1: i32) -> (i32, i32) {
    %c0_i32 = arith.constant 0 : i32
    %c0_i32_0 = arith.constant 0 : i32
    %c0_i32_1 = arith.constant 0 : i32
    return %c0_i32, %c0_i32_0 : i32, i32
  }
  func.func @transform_6(%arg0: i32, %arg1: i32) -> (i32, i32) {
    %c0_i32 = arith.constant 0 : i32
    %c0_i32_0 = arith.constant 0 : i32
    %c0_i32_1 = arith.constant 0 : i32
    return %c0_i32, %c0_i32_0 : i32, i32
  }
  func.func @transform_7(%arg0: i32, %arg1: i32) -> (i32, i32) {
    %c0_i32 = arith.constant 0 : i32
    %c0_i32_0 = arith.constant 0 : i32
    %c0_i32_1 = arith.constant 0 : i32
    return %c0_i32, %c0_i32_0 : i32, i32
  }
  func.func @transform_8(%arg0: i32, %arg1: i32) -> (i32, i32, i32) {
    %c0_i32 = arith.constant 0 : i32
    %c0_i32_0 = arith.constant 0 : i32
    return %arg0, %c0_i32, %arg1 : i32, i32, i32
  }
}

</mosaic_0001>

<bundles_post_ra>
// kernel: tpu_custom_call.1
= control target key start
LH: loop header
LB: loop body
LE: loop exit
PB: predicated region body
PF: predicated region fallthrough
CT: control target
= control target key end

     0   :  { %s2408_s0 = inlined_call_operand.hbm [shape: f32[2,16,3], index: 0, kind: input, shape index: {}]   ;;  %s2409_s1 = inlined_call_operand.hbm [shape: f32[2,3,128], index: 1, kind: input, shape index: {}]   ;;  %s2410_s2 = inlined_call_operand.hbm [shape: f32[2,1,128], index: 2, kind: input, shape index: {}]   ;;  %s2411_s3 = inlined_call_operand.hbm [shape: f32[2,16,8], index: 3, kind: input, shape index: {}]   ;;  %s2412_s4 = inlined_call_operand.hbm [shape: f32[8,3], index: 4, kind: input, shape index: {}]   ;;  %s2413_s5 = inlined_call_operand.hbm [shape: f32[3,8], index: 5, kind: input, shape index: {}]   ;;  %s2414_s6 = inlined_call_operand.hbm [shape: f32[8,1], index: 6, kind: input, shape index: {}]   ;;  %s2415_s7 = inlined_call_operand.hbm [shape: f32[8,1], index: 7, kind: input, shape index: {}]   ;;  %s2416_s8 = inlined_call_operand.hbm [shape: f32[2,16,128], index: 8, kind: output, shape index: {}]  }
   0x1   :  { %2435 = sst [smem:[#allocation30_spill]] %s2408_s0 }
   0x2   :  { %2436 = sst [smem:[#allocation31_spill]] %s2409_s1 }
   0x3   :  { %2437 = sst [smem:[#allocation32_spill]] %s2412_s4 }
   0x4   :  { %2438 = sst [smem:[#allocation33_spill]] %s2413_s5 }
   0x5   :  { %2439 = sst [smem:[#allocation34_spill]] %s2414_s6 }
   0x6   :  { %2440 = sst [smem:[#allocation35_spill]] %s2415_s7 }
   0x7   :  { %2441 = sst [smem:[#allocation36_spill]] %s2416_s8 }
   0x8   :  { %13 = vsyncpa [#allocation3], 0 }
   0x9   :  { %15 = vsyncpa [#allocation3 + $0x1], 0 }
   0xa   :  { %16 = vsyncpa [#allocation6], 0 }
   0xb   :  { %18 = vsyncpa [#allocation6 + $0x1], 0 }
   0xc   :  { %19 = vsyncpa [#allocation9], 0 }
   0xd   :  { %21 = vsyncpa [#allocation9 + $0x1], 0 }
   0xe   :  { %22 = vsyncpa [#allocation12], 0 }
   0xf   :  { %23 = vsyncpa [#allocation15], 0 }
  0x10   :  { %24 = vsyncpa [#allocation4], 0 }
  0x11   :  { %26 = vsyncpa [#allocation4 + $0x1], 0  ;;  %s1919_s27 = smov 0   ;;  %s1921_s28 = smov 0  }
  0x12   :  { %s1923_s29 = smov 0   ;;  %s1925_s30 = smov 0  }
  0x13   :  { %s1927_s9 = smov 0   ;;  %s1929_s10 = smov 0  }
  0x14 LB: > { %2442 = sst [smem:[#allocation24_spill]] %s1835_s27  ;;  %s1950_s11 = sadd.s32 4294967295, %s1855_s10   ;;  %s1855_s10 = sphi %s1929_s10, %s32_s10   ;;  %s1851_s9 = sphi %s1927_s9, %s2489_s9   ;;  %s1847_s30 = sphi %s1925_s30, %s2488_s30   ;;  %s1843_s29 = sphi %s1923_s29, %s2484_s29   ;;  %s1839_s28 = sphi %s1921_s28, %s2487_s28   ;;  %s1835_s27 = sphi %s1919_s27, %s2486_s27  }
  0x15   : > { %2443 = sst [smem:[#allocation25_spill]] %s1843_s29  ;;  %s1338_s12 = sadd.s32 4294967294, %s1855_s10  }
  0x16   : > { %p66_p0 = scmp.ne.s32.totalorder %s1839_s28, %s1835_s27  ;;  %p2417_p1 = scmp.eq.s32.totalorder %s1950_s11, 0 }
  0x17   : > { %p266_p3 = scmp.eq.s32.totalorder %s1338_s12, 1  ;;  %p1339_p5 = scmp.ge.s32.totalorder %s1855_s10, 1 }
  0x18   : > { %p1959_p4 = por %p2417_p1, %p66_p0  ;;  %p273_p7 = scmp.lt.s32.totalorder %s1855_s10, 3 }
  0x19   : > { %p1964_p6 = por %p266_p3, %p66_p0  ;;  %s1857_s16 = smov [#allocation10]  }
  0x1a   : > { %s2444_s13 = scalar_select %p1959_p4, 1, 0 }
  0x1b   : > { %s2445_s14 = scalar_select %p1964_p6, 1, 0 }
  0x1c   : > { %p1969_p8 = pnand %p1339_p5, %p273_p7  ;;  %s286_s17 = sshll.u32 %s1857_s16, 4  ;;  %s287_s17 = int_to_ptr.vmem [resolvable:$true] %s286_s17 }
  0x1d   : > { %2446 = sst [smem:[#allocation26_spill]] %s2445_s14  ;;  %s1858_s18 = smov [#allocation11]  }
  0x1e   : > { %s2447_s15 = scalar_select %p1969_p8, 1, 0 }
  0x1f   : > { %p1418_p10 = pneg %p1969_p8  ;;  %s297_s19 = sshll.u32 %s1858_s18, 4  ;;  %s1982_s19 = int_to_ptr.vmem [resolvable:$true] %s297_s19 }
  0x20   : > { %s2449_s4 = sld [smem:[#allocation32_spill]] }
  0x21   : > { %p1978_p11 = pnand %p1418_p10, %p2417_p1 }
  0x23   : > { %s2448_s20 = scalar_select %p1978_p11, 1, 0 }
  0x24   : > { %p1992_p13 = pneg %p1978_p11 }
  0x26   : > { %s1521_s23 = scalar_lea.hbm %s2449_s4, 128 }
  0x27   : > { %p1522_p12 = scmp.ne.s32.totalorder %s2449_s4, %s1521_s23  ;;  %p1528_p5 = scmp.lt.u32.totalorder %s1521_s23, %s2449_s4 }
  0x28   : > { %s2450_s26 = scalar_select %p1992_p13, 1, 0 }
  0x29   : > { %p1524_p0 = pnand %p1992_p13, %p1522_p12 }
  0x2b   : > { %p1525_p3 = pneg %p1524_p0 }
  0x2d   : > { %p1530_p7 = pnand %p1528_p5, %p1525_p3 }
  0x2f   : > { %1533 = shalt.err (!%p1530_p7)
}
  0x30   : > { %s1534_s18 = scalar_lea.vmem %s287_s17, 128  ;;  %p1542_p2 = scmp.lt.s32.totalorder %s287_s17, %s287_s17 }
  0x31   : > { %p1535_p10 = scmp.ne.s32.totalorder %s287_s17, %s1534_s18  ;;  %p1543_p6 = scmp.lt.s32.totalorder %s1534_s18, %s1534_s18 }
  0x33   : > { %p1537_p9 = pnand %p1535_p10, %p1992_p13  ;;  %p1544_p4 = por %p1543_p6, %p1542_p2 }
  0x35   : > { %p1538_p1 = pneg %p1537_p9 }
  0x37   : > { %p1545_p8 = pnand %p1544_p4, %p1538_p1 }
  0x39   : > { %1548 = shalt.err (!%p1545_p8)
}
  0x3a   : > { %1421 = dma.hbm_to_vmem [thread:$0]  (!%p1978_p11), %s2449_s4, 128, %s287_s17, [#allocation9]  }
  0x3b   : > { %s2451_s5 = sld [smem:[#allocation33_spill]] }
  0x41   : > { %s1549_s25 = scalar_lea.hbm %s2451_s5, 64 }
  0x42   : > { %p1550_p9 = scmp.ne.s32.totalorder %s2451_s5, %s1549_s25  ;;  %p1556_p1 = scmp.lt.u32.totalorder %s1549_s25, %s2451_s5 }
  0x44   : > { %p1552_p12 = pnand %p1550_p9, %p1992_p13 }
  0x46   : > { %p1553_p2 = pneg %p1552_p12 }
  0x48   : > { %p1558_p4 = pnand %p1556_p1, %p1553_p2 }
  0x4a   : > { %1561 = shalt.err (!%p1558_p4)
}
  0x4b   : > { %s1562_s17 = scalar_lea.vmem %s1982_s19, 64  ;;  %p1570_p3 = scmp.lt.s32.totalorder %s1982_s19, %s1982_s19 }
  0x4c   : > { %p1563_p6 = scmp.ne.s32.totalorder %s1982_s19, %s1562_s17  ;;  %p1571_p5 = scmp.lt.s32.totalorder %s1562_s17, %s1562_s17 }
  0x4e   : > { %p1565_p8 = pnand %p1563_p6, %p1992_p13  ;;  %p1572_p7 = por %p1571_p5, %p1570_p3 }
  0x50   : > { %p1566_p0 = pneg %p1565_p8 }
  0x52   : > { %p1573_p10 = pnand %p1572_p7, %p1566_p0 }
  0x54   : > { %1576 = shalt.err (!%p1573_p10)
}
  0x55   : > { %1424 = dma.hbm_to_vmem [thread:$0]  (!%p1978_p11), %s2451_s5, 64, %s1982_s19, [#allocation12]  }
  0x56   : > { %s44_s22 = sadd.s32 1, %s1851_s9  ;;  %s53_s23 = sadd.s32 1, %s1843_s29 }
  0x57   : > { %p46_p9 = scmp.ge.s32.totalorder %s44_s22, 2  ;;  %p60_p12 = scmp.ne.s32.totalorder %s1843_s29, %s1839_s28 }
  0x58   : > { %p61_p2 = scmp.eq.s32.totalorder %s1855_s10, 0  ;;  %p1452_p1 = scmp.lt.s32.totalorder %s1855_s10, 2 }
  0x59   : > { %s2491_s22 = smov (%p46_p9, %s44_s22), 0  ;;  %p2453_p6 = scmp.eq.s32.totalorder %s1950_s11, 1 }
  0x5a   : > { %2452 = sst [smem:[#allocation27_spill]] %s2491_s22  ;;  %p62_p4 = por %p61_p2, %p60_p12 }
  0x5b   : > { %p2041_p8 = por %p2453_p6, %p60_p12  ;;  %s48_s25 = ssub.s32 %s1851_s9, %s2491_s22 }
  0x5c   : > { %s2048_s19 = sand.u32 1, %s1843_s29   ;;  %p51_p0 = scmp.eq.s32.totalorder %s48_s25, 0 }
  0x5d   : > { %s2454_s24 = scalar_select %p2041_p8, 1, 0 }
  0x5e   : > { %p2050_p3 = pnand %p1452_p1, %p62_p4  ;;  %s2424_s16 = sand.u32 1, %s1855_s10  }
  0x5f   : > { %2455 = sst [smem:[#allocation28_spill]] %s2454_s24  ;;  %s1348_s18 = sshll.u32 %s2048_s19, 2 }
  0x60   : > { %s2456_s12 = scalar_select %p2050_p3, 1, 0 }
  0x61   : > { %s2057_s17 = scalar_select %p51_p0, %s1843_s29, %s53_s23  }
  0x62   : > { %s1349_s14 = sshll.u32 %s1851_s9, 6  ;;  %s2458_s1 = sld [smem:[#allocation31_spill]] }
  0x63   : > { %2457 = sst [smem:[#allocation29_spill]] %s2057_s17  ;;  %s357_s25 = scalar_lea.vmem [#allocation5], %s1348_s18 }
  0x64   : > { %s365_s22 = sshll.u32 %s357_s25, 4  ;;  %s2069_s27 = scalar_lea.sflag [#allocation6], %s2424_s16  ;;  %s2065_s22 = int_to_ptr.vmem [resolvable:$true] %s365_s22 }
  0x65   : > { %p2075_p7 = pneg %p2050_p3 }
  0x68   : > { %s2063_s5 = scalar_lea.hbm %s2458_s1, %s1349_s14  ;;  %s1582_s18 = scalar_lea.hbm %s2458_s1, 128 }
  0x69   : > { %s1577_s8 = scalar_lea.hbm %s2063_s5, 64  ;;  %p1583_p12 = scmp.lt.u32.totalorder %s2063_s5, %s2458_s1 }
  0x6a   : > { %p1578_p5 = scmp.ne.s32.totalorder %s2063_s5, %s1577_s8  ;;  %p1584_p2 = scmp.lt.u32.totalorder %s1582_s18, %s1577_s8 }
  0x6b   : > { %p1586_p4 = scmp.lt.u32.totalorder %s1577_s8, %s2063_s5 }
  0x6c   : > { %p1580_p10 = pnand %p2075_p7, %p1578_p5  ;;  %p1585_p1 = por %p1584_p2, %p1583_p12 }
  0x6e   : > { %p1581_p9 = pneg %p1580_p10  ;;  %p1587_p6 = por %p1586_p4, %p1585_p1 }
  0x70   : > { %p1588_p0 = pnand %p1587_p6, %p1581_p9 }
  0x72   : > { %1591 = shalt.err (!%p1588_p0)
}
  0x73   : > { %s1592_s16 = scalar_lea.vmem %s2065_s22, 64  ;;  %s1859_s4 = smov [#allocation5]  }
  0x74   : > { %p1593_p5 = scmp.ne.s32.totalorder %s2065_s22, %s1592_s16  ;;  %s1597_s14 = sshll.u32 %s1859_s4, 4  ;;  %s1598_s14 = int_to_ptr.vmem [resolvable:$false] %s1597_s14 }
  0x75   : > { %s1599_s21 = scalar_lea.vmem %s1598_s14, 128  ;;  %p1600_p11 = scmp.lt.s32.totalorder %s2065_s22, %s1598_s14 }
  0x76   : > { %p1595_p10 = pnand %p1593_p5, %p2075_p7  ;;  %p1601_p13 = scmp.lt.s32.totalorder %s1599_s21, %s1592_s16 }
  0x78   : > { %p1596_p8 = pneg %p1595_p10  ;;  %p1602_p12 = por %p1601_p13, %p1600_p11 }
  0x7a   : > { %p1603_p2 = pnand %p1602_p12, %p1596_p8 }
  0x7c   : > { %1606 = shalt.err (!%p1603_p2)
}
  0x7d   : > { %1437 = dma.hbm_to_vmem [thread:$0]  (!%p2050_p3), %s2063_s5, 64, %s2065_s22, %s2069_s27  }
  0x7e   : > { %s1860_s8 = smov [#allocation13]   ;;  %s1861_s25 = smov [#allocation14]  }
  0x7f   : > { %s308_s18 = sshll.u32 %s1860_s8, 4  ;;  %s319_s1 = sshll.u32 %s1861_s25, 4  ;;  %s309_s18 = int_to_ptr.vmem [resolvable:$true] %s308_s18  ;;  %s2099_s1 = int_to_ptr.vmem [resolvable:$true] %s319_s1 }
  0x80   : > { %s2460_s6 = sld [smem:[#allocation34_spill]]  ;;  %p2461_p13 = scmp.ne.s32.totalorder %s2450_s26, 0 }
  0x86   : > { %s1607_s16 = scalar_lea.hbm %s2460_s6, 128 }
  0x87   : > { %p1608_p11 = scmp.ne.s32.totalorder %s2460_s6, %s1607_s16  ;;  %p1614_p1 = scmp.lt.u32.totalorder %s1607_s16, %s2460_s6 }
  0x89   : > { %p1610_p8 = pnand %p1608_p11, %p2461_p13 }
  0x8b   : > { %p1611_p9 = pneg %p1610_p8 }
  0x8d   : > { %p1616_p4 = pnand %p1614_p1, %p1611_p9 }
  0x8f   : > { %1619 = shalt.err (!%p1616_p4)
}
  0x90   : > { %s1620_s22 = scalar_lea.vmem %s309_s18, 128  ;;  %p1628_p10 = scmp.lt.s32.totalorder %s309_s18, %s309_s18 }
  0x91   : > { %p1621_p6 = scmp.ne.s32.totalorder %s309_s18, %s1620_s22  ;;  %p1629_p12 = scmp.lt.s32.totalorder %s1620_s22, %s1620_s22 }
  0x93   : > { %p1623_p0 = pnand %p1621_p6, %p2461_p13  ;;  %p1630_p2 = por %p1629_p12, %p1628_p10 }
  0x95   : > { %p1624_p5 = pneg %p1623_p0 }
  0x97   : > { %p1631_p3 = pnand %p1630_p2, %p1624_p5 }
  0x99   : > { %1634 = shalt.err (!%p1631_p3)
}
  0x9a   : > { %p2462_p11 = scmp.ne.s32.totalorder %s2448_s20, 0  ;;  %s2463_s7 = sld [smem:[#allocation35_spill]] }
  0x9c   : > { %1427 = dma.hbm_to_vmem [thread:$0]  (!%p2462_p11), %s2460_s6, 128, %s309_s18, [#allocation12]  }
  0xa0   : > { %s1635_s4 = scalar_lea.hbm %s2463_s7, 128 }
  0xa1   : > { %p1636_p8 = scmp.ne.s32.totalorder %s2463_s7, %s1635_s4  ;;  %p1642_p3 = scmp.lt.u32.totalorder %s1635_s4, %s2463_s7 }
  0xa3   : > { %p1638_p9 = pnand %p1636_p8, %p2461_p13 }
  0xa5   : > { %p1639_p1 = pneg %p1638_p9 }
  0xa7   : > { %p1644_p4 = pnand %p1642_p3, %p1639_p1 }
  0xa9   : > { %1647 = shalt.err (!%p1644_p4)
}
  0xaa   : > { %s1648_s18 = scalar_lea.vmem %s2099_s1, 128  ;;  %p1656_p10 = scmp.lt.s32.totalorder %s2099_s1, %s2099_s1 }
  0xab   : > { %p1649_p6 = scmp.ne.s32.totalorder %s2099_s1, %s1648_s18  ;;  %p1657_p12 = scmp.lt.s32.totalorder %s1648_s18, %s1648_s18 }
  0xad   : > { %p1651_p0 = pnand %p1649_p6, %p2461_p13  ;;  %p1658_p2 = por %p1657_p12, %p1656_p10 }
  0xaf   : > { %p1652_p5 = pneg %p1651_p0 }
  0xb1   : > { %p1659_p8 = pnand %p1658_p2, %p1652_p5 }
  0xb3   : > { %1662 = shalt.err (!%p1659_p8)
}
  0xb4   : > { %1430 = dma.hbm_to_vmem [thread:$0]  (!%p2462_p11), %s2463_s7, 128, %s2099_s1, [#allocation15]  }
  0xb5   : > { %s1345_s26 = sshll.u32 %s2048_s19, 4  ;;  %s1374_s8 = sshll.u32 %s1851_s9, 8 }
  0xb6   : > { %s2464_s0 = sld [smem:[#allocation30_spill]]  ;;  %s334_s20 = scalar_lea.vmem [#allocation2], %s1345_s26 }
  0xb7   : > { %s343_s14 = sshll.u32 %s334_s20, 4  ;;  %s331_s16 = scalar_lea.sflag [#allocation3], %s2048_s19  ;;  %s2153_s14 = int_to_ptr.vmem [resolvable:$true] %s343_s14 }
  0xbc   : > { %s2149_s4 = scalar_lea.hbm %s2464_s0, %s1374_s8  ;;  %s1668_s18 = scalar_lea.hbm %s2464_s0, 512 }
  0xbd   : > { %s1663_s21 = scalar_lea.hbm %s2149_s4, 256  ;;  %p1669_p1 = scmp.lt.u32.totalorder %s2149_s4, %s2464_s0 }
  0xbe   : > { %p1664_p13 = scmp.ne.s32.totalorder %s2149_s4, %s1663_s21  ;;  %p1670_p3 = scmp.lt.u32.totalorder %s1668_s18, %s1663_s21 }
  0xbf   : > { %p1672_p6 = scmp.lt.u32.totalorder %s1663_s21, %s2149_s4 }
  0xc0   : > { %p1666_p11 = pnand %p1664_p13, %p2075_p7  ;;  %p1671_p4 = por %p1670_p3, %p1669_p1 }
  0xc2   : > { %p1667_p9 = pneg %p1666_p11  ;;  %p1673_p0 = por %p1672_p6, %p1671_p4 }
  0xc4   : > { %p1674_p5 = pnand %p1673_p0, %p1667_p9 }
  0xc6   : > { %1677 = shalt.err (!%p1674_p5)
}
  0xc7   : > { %s1678_s29 = scalar_lea.vmem %s2153_s14, 256  ;;  %s1862_s25 = smov [#allocation2]  }
  0xc8   : > { %p1679_p10 = scmp.ne.s32.totalorder %s2153_s14, %s1678_s29  ;;  %s1683_s20 = sshll.u32 %s1862_s25, 4  ;;  %s1684_s20 = int_to_ptr.vmem [resolvable:$false] %s1683_s20 }
  0xc9   : > { %s1685_s1 = scalar_lea.vmem %s1684_s20, 512  ;;  %p1686_p8 = scmp.lt.s32.totalorder %s2153_s14, %s1684_s20 }
  0xca   : > { %p1681_p12 = pnand %p1679_p10, %p2075_p7  ;;  %p1687_p13 = scmp.lt.s32.totalorder %s1685_s1, %s1678_s29 }
  0xcc   : > { %p1682_p2 = pneg %p1681_p12  ;;  %p1688_p11 = por %p1687_p13, %p1686_p8 }
  0xce   : > { %p1689_p1 = pnand %p1688_p11, %p1682_p2 }
  0xd0   : > { %1692 = shalt.err (!%p1689_p1)
}
  0xd1   : > { %s1863_s21 = smov 128   ;;  %s1864_s5 = smov 8  }
  0xd2   : > { %p2465_p9 = scmp.ne.s32.totalorder %s2456_s12, 0  ;;  %s2187_s17 = scalar_lea.hbm %s2411_s3, %s1374_s8 }
  0xd3   : > { %s394_s29 = scalar_lea.vmem [#allocation8], %s1345_s26  ;;  %s1350_s20 = sshll.u32 %s1851_s9, 4 }
  0xd4   : > { %1434 = dma.hbm_to_vmem [thread:$0]  (!%p2465_p9), %s2149_s4, 256, %s2153_s14, %s331_s16, %s1863_s21, %s1863_s21, %s1864_s5  }
  0xd5   : > { %s403_s25 = sshll.u32 %s394_s29, 4  ;;  %s375_s1 = scalar_lea.vmem [#allocation7], %s2048_s19  ;;  %s2191_s25 = int_to_ptr.vmem [resolvable:$true] %s403_s25 }
  0xd6   : > { %s383_s0 = sshll.u32 %s375_s1, 4  ;;  %s381_s24 = scalar_lea.hbm %s2410_s2, %s1350_s20  ;;  %s384_s0 = int_to_ptr.vmem [resolvable:$true] %s383_s0 }
  0xd7   : > { %s1693_s4 = scalar_lea.hbm %s381_s24, 16  ;;  %s1698_s26 = scalar_lea.hbm %s2410_s2, 32 }
  0xd8   : > { %p1694_p3 = scmp.ne.s32.totalorder %s381_s24, %s1693_s4  ;;  %p1699_p0 = scmp.lt.u32.totalorder %s381_s24, %s2410_s2 }
  0xd9   : > { %p1700_p5 = scmp.lt.u32.totalorder %s1698_s26, %s1693_s4  ;;  %p1702_p12 = scmp.lt.u32.totalorder %s1693_s4, %s381_s24 }
  0xda   : > { %p1696_p4 = pnand %p1694_p3, %p2075_p7 }
  0xdb   : > { %p1701_p10 = por %p1700_p5, %p1699_p0 }
  0xdc   : > { %p1697_p6 = pneg %p1696_p4 }
  0xdd   : > { %p1703_p2 = por %p1702_p12, %p1701_p10 }
  0xdf   : > { %p1704_p8 = pnand %p1703_p2, %p1697_p6 }
  0xe1   : > { %1707 = shalt.err (!%p1704_p8)
}
  0xe2   : > { %s1708_s6 = scalar_lea.vmem %s384_s0, 16  ;;  %s1865_s7 = smov [#allocation7]  }
  0xe3   : > { %p1709_p13 = scmp.ne.s32.totalorder %s384_s0, %s1708_s6  ;;  %s1713_s19 = sshll.u32 %s1865_s7, 4  ;;  %s1714_s19 = int_to_ptr.vmem [resolvable:$false] %s1713_s19 }
  0xe4   : > { %s1715_s22 = scalar_lea.vmem %s1714_s19, 32  ;;  %p1716_p3 = scmp.lt.s32.totalorder %s384_s0, %s1714_s19 }
  0xe5   : > { %p1711_p11 = pnand %p1709_p13, %p2075_p7  ;;  %p1717_p4 = scmp.lt.s32.totalorder %s1715_s22, %s1708_s6 }
  0xe7   : > { %p1712_p1 = pneg %p1711_p11  ;;  %p1718_p9 = por %p1717_p4, %p1716_p3 }
  0xe9   : > { %p1719_p0 = pnand %p1718_p9, %p1712_p1 }
  0xeb   : > { %1722 = shalt.err (!%p1719_p0)
}
  0xec   : > { %p2466_p5 = scmp.ne.s32.totalorder %s2456_s12, 0  ;;  %s2467_s29 = sand.u32 1, %s1855_s10  }
  0xed   : > { %s2213_s20 = scalar_lea.sflag [#allocation9], %s2467_s29  ;;  %s1723_s1 = scalar_lea.hbm %s2187_s17, 256 }
  0xee   : > { %1440 = dma.hbm_to_vmem [thread:$0]  (!%p2466_p5), %s381_s24, 16, %s384_s0, %s2069_s27  }
  0xef   : > { %p1724_p6 = scmp.ne.s32.totalorder %s2187_s17, %s1723_s1  ;;  %s1728_s14 = scalar_lea.hbm %s2411_s3, 512 }
  0xf0   : > { %p1729_p9 = scmp.lt.u32.totalorder %s2187_s17, %s2411_s3  ;;  %p1730_p2 = scmp.lt.u32.totalorder %s1728_s14, %s1723_s1 }
  0xf1   : > { %p1726_p10 = pnand %p1724_p6, %p2075_p7  ;;  %p1732_p13 = scmp.lt.u32.totalorder %s1723_s1, %s2187_s17 }
  0xf2   : > { %p1731_p8 = por %p1730_p2, %p1729_p9 }
  0xf3   : > { %p1727_p12 = pneg %p1726_p10 }
  0xf4   : > { %p1733_p11 = por %p1732_p13, %p1731_p8 }
  0xf6   : > { %p1734_p1 = pnand %p1733_p11, %p1727_p12 }
  0xf8   : > { %1737 = shalt.err (!%p1734_p1)
}
  0xf9   : > { %s1738_s0 = scalar_lea.vmem %s2191_s25, 256  ;;  %s1866_s27 = smov [#allocation8]  }
  0xfa   : > { %p1739_p3 = scmp.ne.s32.totalorder %s2191_s25, %s1738_s0  ;;  %s1743_s24 = sshll.u32 %s1866_s27, 4  ;;  %s1744_s24 = int_to_ptr.vmem [resolvable:$false] %s1743_s24 }
  0xfb   : > { %s1745_s18 = scalar_lea.vmem %s1744_s24, 512  ;;  %p1746_p6 = scmp.lt.s32.totalorder %s2191_s25, %s1744_s24 }
  0xfc   : > { %p1741_p4 = pnand %p1739_p3, %p2075_p7  ;;  %p1747_p10 = scmp.lt.s32.totalorder %s1745_s18, %s1738_s0 }
  0xfe   : > { %p1742_p0 = pneg %p1741_p4  ;;  %p1748_p9 = por %p1747_p10, %p1746_p6 }
 0x100   : > { %p1749_p2 = pnand %p1748_p9, %p1742_p0 }
 0x102   : > { %1752 = shalt.err (!%p1749_p2)
}
 0x103   : > { %1443 = dma.hbm_to_vmem [thread:$0]  (!%p2466_p5), %s2187_s17, 256, %s2191_s25, %s2213_s20, %s1863_s21, %s1863_s21, %s1864_s5  }
 0x104   : > { %p2468_p7 = scmp.ne.s32.totalorder %s2447_s15, 0 }
 0x105   : > { %s2243_s23 = sand.u32 (!%p2468_p7), 1, %s1839_s28   ;;  %p2469_p12 = scmp.ne.s32.totalorder (!%p2468_p7), %s2444_s13, 0 }
 0x106   : > { %415 = sbr.rel (%p2468_p7) target bundleno = 656 (0x290), region = 52  ;;  %s2246_s6 = sshll.u32 (!%p2468_p7), %s2243_s23, 4 }
 0x107   : > { %s418_s12 = scalar_lea.sflag (!%p2468_p7), [#allocation3], %s2243_s23  ;;  %s421_s7 = scalar_lea.vmem (!%p2468_p7), [#allocation2], %s2246_s6 }
 0x10d   : > { %1806 = dma.done.wait (%p2469_p12), %s418_s12, 256  }
 0x10e   : > { %1808 = vsyncadd (%p2469_p12), %s418_s12, 4294967040  ;;  %s426_s15 = sand.u32 1, %s1950_s11   ;;  %s1356_s21 = sshll.u32 %s2243_s23, 2 }
 0x10f   : > { %s427_s5 = scalar_lea.sflag [#allocation6], %s426_s15  ;;  %s430_s17 = scalar_lea.vmem [#allocation5], %s1356_s21 }
 0x110   : > { %1810 = dma.done.wait (%p2469_p12), %s427_s5, 80  }
 0x111   : > { %1812 = vsyncadd (%p2469_p12), %s427_s5, 4294967216  ;;  %s438_s25 = scalar_lea.vmem [#allocation7], %s2243_s23  ;;  %s444_s19 = scalar_lea.sflag [#allocation9], %s426_s15 }
 0x112   : > { %s447_s22 = scalar_lea.vmem [#allocation8], %s2246_s6 }
 0x113   : > { %1814 = dma.done.wait (%p2469_p12), %s444_s19, 256  }
 0x114   : > { %1816 = vsyncadd (%p2469_p12), %s444_s19, 4294967040  ;;  %p2470_p5 = scmp.eq.s32.totalorder %s1950_s11, 0 }
 0x116   : > { %1818 = dma.done.wait (%p2470_p5), [#allocation9], 128   ;;  %p2471_p8 = pmov %p2470_p5 }
 0x117   : > { %p2472_p13 = pmov %p2470_p5 }
 0x118   : > { %1820 = vsyncadd (%p2471_p8), [#allocation9], 4294967168 }
 0x119   : > { %1822 = dma.done.wait (%p2472_p13), [#allocation12], 192   ;;  %p2473_p11 = pmov %p2470_p5 }
 0x11a   : > { %p2474_p1 = pmov %p2470_p5 }
 0x11b   : > { %1824 = vsyncadd (%p2473_p11), [#allocation12], 4294967104 }
 0x11c   : > { %1826 = dma.done.wait (%p2474_p1), [#allocation15], 128   ;;  %p2475_p3 = pmov %p2474_p1 }
 0x11d   : > { %v1867_v0 = vmov 0.0   ;;  %vm1868_vm0 = vmmov 0   ;;  %v1869_v1 = vmov 0   ;;  %vm536_vm1 = vcmask 1042432   ;;  %v617_v2 = vld [vmem:[#allocation11] sm:$0x7] }
 0x11e   : > { %1828 = vsyncadd (%p2475_p3), [#allocation15], 4294967168  ;;  %1382 = vmatprep.subr.mxu0 %v1867_v0  ;;  %1384 = vmatprep.mubr.msk.f32.mxu0 %vm1868_vm0, %v1867_v0  ;;  %vm532_vm2 = vcmask 23552   ;;  %v512_v3 = vld [vmem:[%s421_s7] sm:$0xff]  ;;  %v513_v4 = vld [vmem:[%s421_s7 + $0x8] sm:$0xff]  ;;  %v708_v11 = vlaneseq  ;;  %s2326_s11 = scalar_lea.vmem [#allocation16], %s2246_s6 }
 0x11f   : > { %1518 = vset.pattern.permute.xlu0 %v1869_v1  ;;  %1387 = vmatprep.subr.msk.mxu1 %vm536_vm1, %v617_v2  ;;  %v514_v5 = vld [vmem:[%s430_s17] sm:$0x7]  ;;  %v518_v6 = vld [vmem:[#allocation10] sm:$0xff]  ;;  %v519_v7 = vld [vmem:[#allocation13] sm:$0xff]  ;;  %v1870_v9 = vmov 1966171168  }
 0x120   : > { %1389 = vmatprep.mubr.msk.f32.mxu1 %vm532_vm2, %v512_v3  ;;  %1388 = vmatpush3.msk.msra.mxu1 %vm536_vm1, %v617_v2  ;;  %v610_v8 = vld [vmem:[#allocation14] sm:$0xff]  ;;  %v706_v10 = vunpack.c.l.s4 %v1870_v9  ;;  %v709_v13 = vshrl.u32 %v708_v11, 7  ;;  %s2476_s13 = sld [smem:[#allocation28_spill]]  ;;  %s1145_s29 = sshll.u32 %s2326_s11, 4  ;;  %s2353_s29 = int_to_ptr.vmem [resolvable:$true] %s1145_s29 }
 0x121   : > { %1383 = vmatpush3.msk.msra.mxu0 %vm536_vm1, %v514_v5  ;;  %1390 = vmatmul.mubr.msk.f32.vlgmr.msra.gmra.mrb[0].mxu1 %vm532_vm2, %v513_v4  ;;  %v516_v15 = vld [vmem:[%s447_s22] sm:$0xff]  ;;  %v517_v38 = vld [vmem:[%s447_s22 + $0x8] sm:$0xff]  ;;  %s1376_s20 = sshll.u32 %s1847_s30, 8  ;;  %s2477_s8 = sld [smem:[#allocation36_spill]] }
 0x122   : > { %1385 = vmatmul.mubr.msk.f32.vlgmr.msra.gmra.mrb[0].mxu0 %vm532_vm2, %v518_v6  ;;  %522 = vperm.xlu0 %1518, %v519_v7   ;;  %v707_v12 = vunpack.c.0.s8 %v706_v10  ;;  %v2283_v17 = vsub.s32 0, %v709_v13  ;;  %v884_v25 = vcombine.high %v516_v15, %v516_v15  ;;  %v933_v49 = vcombine.high %v517_v38, %v517_v38  ;;  %v1363_v61 = vld [vmem:[%s438_s25] ss:$0 sm:$0xff]  ;;  %s1131_s26 = scalar_lea.sflag [#allocation4], %s2243_s23  ;;  %s1753_s16 = scalar_lea.vmem %s2353_s29, 256 }
 0x123   : > { %p1754_p4 = scmp.ne.s32.totalorder %s2353_s29, %s1753_s16  ;;  %s1871_s30 = smov [#allocation16]  }
 0x124   : > { %v2278_v14 = vsub.s32 %v707_v12, %v709_v13  ;;  %s1757_s0 = sshll.u32 %s1871_s30, 4  ;;  %s1758_s0 = int_to_ptr.vmem [resolvable:$false] %s1757_s0 }
 0x125   : > { %s1759_s27 = scalar_lea.vmem %s1758_s0, 512  ;;  %p1760_p9 = scmp.lt.s32.totalorder %s2353_s29, %s1758_s0 }
 0x126   : > { %613 = vperm.xlu0 %1518, %v610_v8   ;;  %v891_v16 = vrot.slane %v516_v15, %v2278_v14  ;;  %v898_v28 = vrot.slane %v884_v25, %v2278_v14  ;;  %v940_v39 = vrot.slane %v517_v38, %v2278_v14  ;;  %v947_v50 = vrot.slane %v933_v49, %v2278_v14  ;;  %p2478_p0 = scmp.ne.s32.totalorder %s2476_s13, 0  ;;  %p1761_p2 = scmp.lt.s32.totalorder %s1759_s27, %s1753_s16 }
 0x127   : > { %s2358_s14 = scalar_lea.hbm %s2477_s8, %s1376_s20 }
 0x128   : > { %v907_v18 = vrot.slane %v891_v16, %v2278_v14  ;;  %v899_v19 = vcombine.high %v891_v16, %v891_v16  ;;  %v914_v29 = vrot.slane %v898_v28, %v2278_v14  ;;  %v900_v31 = vcombine.high %v898_v28, %v898_v28  ;;  %p1755_p6 = pnand %p1754_p4, %p2478_p0  ;;  %p1762_p7 = por %p1761_p2, %p1760_p9 }
 0x129   : > { %v956_v40 = vrot.slane %v940_v39, %v2278_v14  ;;  %v948_v42 = vcombine.high %v940_v39, %v940_v39  ;;  %v963_v51 = vrot.slane %v947_v50, %v2278_v14  ;;  %v949_v53 = vcombine.high %v947_v50, %v947_v50 }
 0x12a   : > { %v985_v20 = vrot.slane %v907_v18, %v2283_v17  ;;  %v929_v21 = vcombine.high %v907_v18, %v907_v18  ;;  %v921_v22 = vrot.slane %v899_v19, %v2278_v14  ;;  %v1001_v30 = vrot.slane %v914_v29, %v2283_v17  ;;  %p1756_p10 = pneg %p1755_p6 }
 0x12b   : > { %v928_v32 = vrot.slane %v900_v31, %v2278_v14  ;;  %v930_v34 = vcombine.high %v914_v29, %v914_v29  ;;  %v1017_v41 = vrot.slane %v956_v40, %v2283_v17  ;;  %v970_v43 = vrot.slane %v948_v42, %v2278_v14 }
 0x12c   : > { %v989_v23 = vrot.slane %v921_v22, %v2283_v17  ;;  %v993_v24 = vrot.slane %v929_v21, %v2283_v17  ;;  %v931_v26 = vcombine.high %v921_v22, %v921_v22  ;;  %v978_v45 = vcombine.high %v956_v40, %v956_v40  ;;  %p1763_p12 = pnand %p1762_p7, %p1756_p10 }
 0x12d   : > { %v1005_v33 = vrot.slane %v928_v32, %v2283_v17  ;;  %v1009_v35 = vrot.slane %v930_v34, %v2283_v17  ;;  %v932_v36 = vcombine.high %v928_v32, %v928_v32  ;;  %v1021_v44 = vrot.slane %v970_v43, %v2283_v17 }
 0x12e   : > { %v997_v27 = vrot.slane %v931_v26, %v2283_v17  ;;  %v1025_v46 = vrot.slane %v978_v45, %v2283_v17  ;;  %v980_v47 = vcombine.high %v970_v43, %v970_v43  ;;  %v1033_v52 = vrot.slane %v963_v51, %v2283_v17 }
 0x12f   : > { %v1013_v37 = vrot.slane %v932_v36, %v2283_v17  ;;  %v977_v54 = vrot.slane %v949_v53, %v2278_v14  ;;  %v979_v56 = vcombine.high %v963_v51, %v963_v51 }
 0x130   : > { %v1029_v48 = vrot.slane %v980_v47, %v2283_v17 }
 0x131   : > { %v1037_v55 = vrot.slane %v977_v54, %v2283_v17  ;;  %v1041_v57 = vrot.slane %v979_v56, %v2283_v17  ;;  %v981_v58 = vcombine.high %v977_v54, %v977_v54 }
 0x133   : > { %v1045_v59 = vrot.slane %v981_v58, %v2283_v17 }
 0x144   : > { %1097 = vxpose.xlu0.b32.start [1/16] (narrow) %v985_v20, 8 }
 0x148   : > { %1098 = vxpose.xlu0.b32.cont [2/16] (narrow) %v989_v23, 8 }
 0x14c   : > { %1099 = vxpose.xlu0.b32.cont [3/16] (narrow) %v993_v24, 8 }
 0x150   : > { %1100 = vxpose.xlu0.b32.cont [4/16] (narrow) %v997_v27, 8 }
 0x154   : > { %1101 = vxpose.xlu0.b32.cont [5/16] (narrow) %v1001_v30, 8 }
 0x158   : > { %1102 = vxpose.xlu0.b32.cont [6/16] (narrow) %v1005_v33, 8 }
 0x15c   : > { %1103 = vxpose.xlu0.b32.cont [7/16] (narrow) %v1009_v35, 8 }
 0x160   : > { %1104 = vxpose.xlu0.b32.cont [8/16] (narrow) %v1013_v37, 8 }
 0x164   : > { %1105 = vxpose.xlu0.b32.cont [9/16] (narrow) %v1017_v41, 8 }
 0x168   : > { %1106 = vxpose.xlu0.b32.cont [10/16] (narrow) %v1021_v44, 8 }
 0x16c   : > { %1107 = vxpose.xlu0.b32.cont [11/16] (narrow) %v1025_v46, 8 }
 0x170   : > { %1108 = vxpose.xlu0.b32.cont [12/16] (narrow) %v1029_v48, 8 }
 0x174   : > { %1109 = vxpose.xlu0.b32.cont [13/16] (narrow) %v1033_v52, 8 }
 0x178   : > { %1110 = vxpose.xlu0.b32.cont [14/16] (narrow) %v1037_v55, 8 }
 0x17c   : > { %1111 = vxpose.xlu0.b32.cont [15/16] (narrow) %v1041_v57, 8 }
 0x180   : > { %1112 = vxpose.xlu0.b32.end [16/16] (narrow) %v1045_v59, 8 }
 0x1a1   : > { %v523_v60 = vpop.permute.xlu0 %522 }
 0x1a2   : > { %v531_v62 = vmul.f32 %v1363_v61, %v523_v60 }
 0x1a5   : > { %v614_v63 = vpop.permute.xlu0 %613 }
 0x1c4   : > { %v1113_v19 = vpop.trf.xlu0 }
 0x1c5   : > { %1129 = vst [vmem:[%s2326_s11 + $0x8] sm:$0xff] %v1113_v19 }
 0x1f4   : > { %v1391_v0 = vpop.f32.mrb[0].mxu1 }
 0x1f5   : > { %v606_v1 = vpop.f32.mrb[0].mxu0  ;;  %v693_v2 = vpop.f32.mrb[1].mxu1  ;;  %v760_v27 = vrot.slane %v1391_v0, %v2278_v14  ;;  %v753_v35 = vcombine.high %v1391_v0, %v1391_v0 }
 0x1f6   : > { %v607_v3 = vadd.f32 %v606_v1, %v531_v62  ;;  %v1386_v4 = vpop.f32.mrb[1].mxu0  ;;  %v711_v5 = vrot.slane %v693_v2, %v2278_v14  ;;  %v704_v11 = vcombine.high %v693_v2, %v693_v2 }
 0x1f7   : > { %v768_v30 = vcombine.high %v760_v27, %v760_v27  ;;  %v776_v32 = vrot.slane %v760_v27, %v2278_v14  ;;  %v767_v38 = vrot.slane %v753_v35, %v2278_v14 }
 0x1f8   : > { %v2317_v6 = vadd.f32 %v614_v63, %v607_v3  ;;  %v719_v7 = vcombine.high %v711_v5, %v711_v5  ;;  %v727_v8 = vrot.slane %v711_v5, %v2278_v14  ;;  %v718_v15 = vrot.slane %v704_v11, %v2278_v14 }
 0x1f9   : > { %v837_v33 = vrot.slane %v776_v32, %v2283_v17  ;;  %v790_v34 = vrot.slane %v768_v30, %v2278_v14  ;;  %v798_v37 = vcombine.high %v776_v32, %v776_v32  ;;  %v783_v42 = vrot.slane %v767_v38, %v2278_v14 }
 0x1fa   : > { %v805_v9 = vrot.slane %v727_v8, %v2283_v17  ;;  %v741_v10 = vrot.slane %v719_v7, %v2278_v14  ;;  %v749_v13 = vcombine.high %v727_v8, %v727_v8  ;;  %v720_v20 = vcombine.high %v718_v15, %v718_v15 }
 0x1fb   : > { %v734_v22 = vrot.slane %v718_v15, %v2278_v14  ;;  %v841_v36 = vrot.slane %v790_v34, %v2283_v17  ;;  %v845_v39 = vrot.slane %v798_v37, %v2283_v17  ;;  %v800_v40 = vcombine.high %v790_v34, %v790_v34 }
 0x1fc   : > { %1062 = vxpose.xlu1.b32.start [1/16] (narrow) %v805_v9, 8  ;;  %v809_v12 = vrot.slane %v741_v10, %v2283_v17  ;;  %v813_v16 = vrot.slane %v749_v13, %v2283_v17  ;;  %v751_v18 = vcombine.high %v741_v10, %v741_v10  ;;  %v748_v24 = vrot.slane %v720_v20, %v2278_v14 }
 0x1fd   : > { %v821_v23 = vrot.slane %v734_v22, %v2283_v17  ;;  %v750_v26 = vcombine.high %v734_v22, %v734_v22  ;;  %v849_v41 = vrot.slane %v800_v40, %v2283_v17  ;;  %v769_v43 = vcombine.high %v767_v38, %v767_v38 }
 0x1fe   : > { %v817_v21 = vrot.slane %v751_v18, %v2283_v17  ;;  %v825_v25 = vrot.slane %v748_v24, %v2283_v17  ;;  %v752_v29 = vcombine.high %v748_v24, %v748_v24  ;;  %v853_v44 = vrot.slane %v783_v42, %v2283_v17 }
 0x1ff   : > { %v829_v28 = vrot.slane %v750_v26, %v2283_v17  ;;  %v797_v45 = vrot.slane %v769_v43, %v2278_v14  ;;  %v799_v47 = vcombine.high %v783_v42, %v783_v42 }
 0x200   : > { %1063 = vxpose.xlu1.b32.cont [2/16] (narrow) %v809_v12, 8  ;;  %v833_v31 = vrot.slane %v752_v29, %v2283_v17 }
 0x201   : > { %v857_v46 = vrot.slane %v797_v45, %v2283_v17  ;;  %v861_v48 = vrot.slane %v799_v47, %v2283_v17  ;;  %v801_v49 = vcombine.high %v797_v45, %v797_v45 }
 0x203   : > { %v865_v50 = vrot.slane %v801_v49, %v2283_v17 }
 0x204   : > { %1064 = vxpose.xlu1.b32.cont [3/16] (narrow) %v813_v16, 8 }
 0x208   : > { %1065 = vxpose.xlu1.b32.cont [4/16] (narrow) %v817_v21, 8 }
 0x20c   : > { %1066 = vxpose.xlu1.b32.cont [5/16] (narrow) %v821_v23, 8 }
 0x210   : > { %1067 = vxpose.xlu1.b32.cont [6/16] (narrow) %v825_v25, 8 }
 0x214   : > { %1068 = vxpose.xlu1.b32.cont [7/16] (narrow) %v829_v28, 8 }
 0x218   : > { %1069 = vxpose.xlu1.b32.cont [8/16] (narrow) %v833_v31, 8 }
 0x21c   : > { %1070 = vxpose.xlu1.b32.cont [9/16] (narrow) %v837_v33, 8 }
 0x220   : > { %1071 = vxpose.xlu1.b32.cont [10/16] (narrow) %v841_v36, 8 }
 0x224   : > { %1072 = vxpose.xlu1.b32.cont [11/16] (narrow) %v845_v39, 8 }
 0x228   : > { %1073 = vxpose.xlu1.b32.cont [12/16] (narrow) %v849_v41, 8 }
 0x22c   : > { %1074 = vxpose.xlu1.b32.cont [13/16] (narrow) %v853_v44, 8 }
 0x230   : > { %1075 = vxpose.xlu1.b32.cont [14/16] (narrow) %v857_v46, 8 }
 0x234   : > { %1076 = vxpose.xlu1.b32.cont [15/16] (narrow) %v861_v48, 8 }
 0x238   : > { %1077 = vxpose.xlu1.b32.end [16/16] (narrow) %v865_v50, 8 }
 0x27c   : > { %v1078_v51 = vpop.trf.xlu1 }
 0x27d   : > { %v1094_v14 = vadd.f32 %v1078_v51, %v2317_v6 }
 0x27f   : > { %v1095_v52 = vmax.f32 %v1094_v14, 0.0 }
 0x281   : > { %1096 = vst [vmem:[%s2326_s11] sm:$0xff] %v1095_v52 }
 0x282   : > { %1766 = shalt.err (!%p1763_p12)
}
 0x283   : > { %s1767_s24 = scalar_lea.hbm %s2358_s14, 256  ;;  %s1771_s12 = scalar_lea.hbm %s2477_s8, 512 }
 0x284   : > { %p1768_p5 = scmp.ne.s32.totalorder %s2358_s14, %s1767_s24  ;;  %p1772_p11 = scmp.lt.u32.totalorder %s2358_s14, %s2477_s8 }
 0x285   : > { %p1773_p1 = scmp.lt.u32.totalorder %s1771_s12, %s1767_s24  ;;  %p1775_p4 = scmp.lt.u32.totalorder %s1767_s24, %s2358_s14 }
 0x286   : > { %p1769_p8 = pnand %p1768_p5, %p2478_p0 }
 0x287   : > { %p1774_p3 = por %p1773_p1, %p1772_p11 }
 0x288   : > { %p1770_p13 = pneg %p1769_p8 }
 0x289   : > { %p1776_p6 = por %p1775_p4, %p1774_p3 }
 0x28b   : > { %p1777_p10 = pnand %p1776_p6, %p1770_p13 }
 0x28d   : > { %1780 = shalt.err (!%p1777_p10)
}
 0x28e   : > { %s1872_s21 = smov 128   ;;  %s1873_s5 = smov 8  }
 0x28f   : > { %1416 = dma.vmem_to_hbm [thread:$0]  (%p2478_p0), %s2353_s29, 256, %s2358_s14, %s1131_s26, %s1872_s21, %s1872_s21, %s1873_s5  }
 0x290 PF: > { %s2479_s17 = sld [smem:[#allocation24_spill]]  ;;  %s2480_s25 = sld [smem:[#allocation26_spill]] }
 0x291   : > { %p2482_p2 = scmp.ge.s32.totalorder %s1855_s10, 2 }
 0x296   : > { %s1160_s19 = sand.u32 1, %s2479_s17   ;;  %p2481_p9 = scmp.ne.s32.totalorder %s2480_s25, 0 }
 0x297   : > { %s1161_s22 = scalar_lea.sflag [#allocation4], %s1160_s19 }
 0x298   : > { %p1445_p7 = pnand %p2482_p2, %p2481_p9 }
 0x29a   : > { %1830 = dma.done.wait (!%p1445_p7), %s1161_s22, 256  }
 0x29b   : > { %1832 = vsyncadd (!%p1445_p7), %s1161_s22, 4294967040  ;;  %s32_s10 = sadd.s32 1, %s1855_s10   ;;  %s2483_s11 = sld [smem:[#allocation25_spill]] }
 0x29c   : > { %p29_p12 = scmp.ge.s32.totalorder %s32_s10, 4   ;;  %s2484_s29 = sld [smem:[#allocation29_spill]] }
 0x29d   : > { %s2485_s23 = sld [smem:[#allocation27_spill]]  ;;  %s2486_s27 = smov %s1839_s28 }
 0x29e   : > { %s2488_s30 = smov %s1851_s9  ;;  %31 = sbr.rel (!%p29_p12) target bundleno = 20 (0x14), region = 150 }
 0x2a1   : > { %s2487_s28 = smov %s2483_s11 }
 0x2a3   : > { %s2489_s9 = smov %s2485_s23 }
 0x2a5   :  { %1166 = vsyncpa [#allocation3], 1 }
 0x2a6   :  { %1168 = vsyncpa [#allocation3 + $0x1], 1 }
 0x2a7   :  { %1169 = vsyncpa [#allocation6], 1 }
 0x2a8   :  { %1171 = vsyncpa [#allocation6 + $0x1], 1 }
 0x2a9   :  { %1172 = vsyncpa [#allocation9], 1 }
 0x2aa   :  { %1174 = vsyncpa [#allocation9 + $0x1], 1 }
 0x2ab   :  { %1175 = vsyncpa [#allocation12], 1 }
 0x2ac   :  { %1176 = vsyncpa [#allocation15], 1 }
 0x2ad   :  { %1177 = vsyncpa [#allocation4], 1 }
 0x2ae   :  { %1179 = vsyncpa [#allocation4 + $0x1], 1 }

</bundles_post_ra>
